<compile_context>
chip_gen: v6e
topology: v6e:2x2x1
jax: 0.10.0
libtpu: 0.0.40
codegen_flags: <defaults>
</compile_context>

<pallas_src>
import jax
import jax.numpy as jnp
from jax.experimental import pallas as pl
from jax.experimental.pallas import tpu as pltpu

_TM_MAX = 2048      # rows per tile (multiple of 8; ~5 MiB double-buffered at D_out_pad=128)
_LANE = 128         # TPU lane width


def _linear_kernel(x_ref, w_ref, b_ref, o_ref):
    # Single MXU pass + bias add. f32 accumulate.
    acc = jnp.dot(x_ref[...], w_ref[...], preferred_element_type=jnp.float32)
    o_ref[...] = (acc + b_ref[...]).astype(o_ref.dtype)


def _round_up(v, m):
    return ((v + m - 1) // m) * m


def dummy_text_encoder_forward(x, weight_t=None, bias=None):
    """Pallas forward for DummyTextEncoder.

    x:        [..., D_in]   float32
    weight_t: [D_in, D_out] float32 (PyTorch weight [D_out, D_in] pre-transposed),
              or None for the Identity configuration (input_dim == output_dim).
    bias:     [D_out]       float32, or None for the Identity configuration.
    returns:  [..., D_out]  float32 (== x when Identity).
    """
    # Identity branch: module configured with input_dim == output_dim -> passthrough.
    # No kernel launch, no HBM traffic.
    if weight_t is None:
        return x

    d_in = x.shape[-1]
    assert weight_t.shape[0] == d_in, "weight_t must be [D_in, D_out]"
    d_out = weight_t.shape[-1]

    lead_shape = x.shape[:-1]
    n = 1
    for s in lead_shape:
        n *= s
    x2d = x.reshape(n, d_in)

    # Pad D_out to a full lane width so output stores are unmasked / lane-dense.
    d_out_p = _round_up(max(d_out, _LANE), _LANE)
    if d_out_p != d_out:
        w_p = jnp.pad(weight_t, ((0, 0), (0, d_out_p - d_out)))
        b_p = jnp.pad(bias, ((0, d_out_p - d_out),)).reshape(1, d_out_p)
    else:
        w_p = weight_t
        b_p = bias.reshape(1, d_out_p)

    # Token-axis tile: full N for small inputs (block == full dim is exempt from
    # the (8,128) rule), otherwise a large multiple-of-8 tile. Ragged last blocks
    # are handled by Pallas (clipped writeback).
    tm = n if n <= _TM_MAX else _TM_MAX
    grid = (pl.cdiv(n, tm),)

    cost = pl.CostEstimate(
        flops=2 * n * d_in * d_out_p,
        transcendentals=0,
        bytes_accessed=4 * (n * d_in + d_in * d_out_p + d_out_p + n * d_out_p),
    )

    out = pl.pallas_call(
        _linear_kernel,
        out_shape=jax.ShapeDtypeStruct((n, d_out_p), jnp.float32),
        grid=grid,
        in_specs=[
            pl.BlockSpec((tm, d_in), lambda i: (i, 0)),        # streamed per tile
            pl.BlockSpec((d_in, d_out_p), lambda i: (0, 0)),   # resident in VMEM
            pl.BlockSpec((1, d_out_p), lambda i: (0, 0)),      # resident in VMEM
        ],
        out_specs=pl.BlockSpec((tm, d_out_p), lambda i: (i, 0)),
        compiler_params=pltpu.CompilerParams(
            dimension_semantics=("parallel",),
        ),
        cost_estimate=cost,
    )(x2d, w_p, b_p)

    if d_out_p != d_out:
        out = out[:, :d_out]
    return out.reshape(*lead_shape, d_out)


if __name__ == "__main__":
    # Small shapes consistent with the module: text embeddings
    # [batch=2, seq=8, input_dim=32] projected to output_dim=64.
    batch, seq = 2, 8
    input_embedding_dim, output_embedding_dim = 32, 64

    key = jax.random.PRNGKey(0)
    kx, kw, kb, kx2 = jax.random.split(key, 4)

    x = jax.random.normal(kx, (batch, seq, input_embedding_dim), dtype=jnp.float32)

    # Deterministic synthetic Linear parameters (PyTorch-style shapes, then
    # pre-transpose the weight for the kernel layout).
    w = jax.random.normal(
        kw, (output_embedding_dim, input_embedding_dim), dtype=jnp.float32
    ) * 0.02
    b = jax.random.normal(kb, (output_embedding_dim,), dtype=jnp.float32) * 0.02
    w_t = w.T  # [D_in, D_out]

    y = dummy_text_encoder_forward(x, w_t, b)
    jax.block_until_ready(y)

    y_ref = x @ w_t + b
    assert y.shape == (batch, seq, output_embedding_dim)
    assert jnp.allclose(y, y_ref, atol=1e-5, rtol=1e-5)

    # Larger, ragged token count to exercise the tiled grid (grid=2, partial last block).
    x_big = jax.random.normal(kx2, (300, 7, input_embedding_dim), dtype=jnp.float32)
    y_big = dummy_text_encoder_forward(x_big, w_t, b)
    jax.block_until_ready(y_big)
    y_big_ref = x_big @ w_t + b
    assert jnp.allclose(y_big, y_big_ref, atol=1e-5, rtol=1e-5)

    # Identity branch: input_dim == output_dim -> module is nn.Identity, pure passthrough.
    x_same = jax.random.normal(kx, (batch, seq, 32), dtype=jnp.float32)
    y_same = dummy_text_encoder_forward(x_same)  # no weight/bias -> Identity
    jax.block_until_ready(y_same)
    assert jnp.allclose(y_same, x_same, atol=0.0, rtol=0.0)

    print("KERNEL_OK")
</pallas_src>

<mosaic_0001>
module attributes {stable_mosaic.version = 11 : i64} {
  func.func @_linear_kernel(%arg0: i32, %arg1: memref<16x32xf32, #tpu.memory_space<vmem>>, %arg2: memref<32x128xf32, #tpu.memory_space<vmem>>, %arg3: memref<1x128xf32, #tpu.memory_space<vmem>>, %arg4: memref<16x128xf32, #tpu.memory_space<vmem>>) attributes {dimension_semantics = [#tpu.dimension_semantics<parallel>], iteration_bounds = array<i64: 1>, scalar_prefetch = 0 : i64, scratch_operands = 0 : i64, tpu.core_type = #tpu.core_type<tc>, window_params = [{transform_indices = @transform_0, window_bounds = array<i64: 16, 32>}, {pipeline_mode = #tpu.pipeline_mode<synchronous>, transform_indices = @transform_1, window_bounds = array<i64: 32, 128>}, {pipeline_mode = #tpu.pipeline_mode<synchronous>, transform_indices = @transform_2, window_bounds = array<i64: 1, 128>}, {transform_indices = @transform_3, window_bounds = array<i64: 16, 128>}]} {
    %c0 = arith.constant 0 : index
    %c0_0 = arith.constant 0 : index
    %0 = vector.load %arg1[%c0, %c0_0] : memref<16x32xf32, #tpu.memory_space<vmem>>, vector<16x32xf32>
    %c0_1 = arith.constant 0 : index
    %c0_2 = arith.constant 0 : index
    %1 = vector.load %arg2[%c0_1, %c0_2] : memref<32x128xf32, #tpu.memory_space<vmem>>, vector<32x128xf32>
    %cst = arith.constant dense<0.000000e+00> : vector<16x128xf32>
    %2 = tpu.matmul %0, %1, %cst {dimension_numbers = #tpu.dot_dimension_numbers<[1], [0], [0], [1], [0, 0, 1, 1], [], []>} : vector<16x32xf32>, vector<32x128xf32>, vector<16x128xf32> -> vector<16x128xf32>
    %c0_3 = arith.constant 0 : index
    %c0_4 = arith.constant 0 : index
    %3 = vector.load %arg3[%c0_3, %c0_4] : memref<1x128xf32, #tpu.memory_space<vmem>>, vector<1x128xf32>
    %4 = vector.broadcast %3 : vector<1x128xf32> to vector<16x128xf32>
    %5 = arith.addf %2, %4 : vector<16x128xf32>
    %c0_5 = arith.constant 0 : index
    %c0_6 = arith.constant 0 : index
    %6 = vector.load %arg4[%c0_5, %c0_6] : memref<16x128xf32, #tpu.memory_space<vmem>>, vector<16x128xf32>
    tpu.vector_store %arg4[%c0_5, %c0_6], %5 {strides = array<i32>} : memref<16x128xf32, #tpu.memory_space<vmem>>, vector<16x128xf32>,
    return
  }
  func.func @transform_0(%arg0: i32) -> (i32, i32) {
    %c0_i32 = arith.constant 0 : i32
    %c0_i32_0 = arith.constant 0 : i32
    return %arg0, %c0_i32 : i32, i32
  }
  func.func @transform_1(%arg0: i32) -> (i32, i32) {
    %c0_i32 = arith.constant 0 : i32
    %c0_i32_0 = arith.constant 0 : i32
    %c0_i32_1 = arith.constant 0 : i32
    return %c0_i32, %c0_i32_0 : i32, i32
  }
  func.func @transform_2(%arg0: i32) -> (i32, i32) {
    %c0_i32 = arith.constant 0 : i32
    %c0_i32_0 = arith.constant 0 : i32
    %c0_i32_1 = arith.constant 0 : i32
    return %c0_i32, %c0_i32_0 : i32, i32
  }
  func.func @transform_3(%arg0: i32) -> (i32, i32) {
    %c0_i32 = arith.constant 0 : i32
    %c0_i32_0 = arith.constant 0 : i32
    return %arg0, %c0_i32 : i32, i32
  }
}

</mosaic_0001>

<bundles_post_ra>
// kernel: tpu_custom_call.1
= control target key start
LH: loop header
LB: loop body
LE: loop exit
PB: predicated region body
PF: predicated region fallthrough
CT: control target
= control target key end

     0   :  { %8 = vsyncpa [#allocation3], 0  ;;  %s297_s0 = inlined_call_operand.hbm [shape: f32[16,32], index: 0, kind: input, shape index: {}]   ;;  %s298_s1 = inlined_call_operand.hbm [shape: f32[32,128], index: 1, kind: input, shape index: {}]   ;;  %s299_s2 = inlined_call_operand.vmem [shape: f32[1,128], index: 2, kind: input, shape index: {}]   ;;  %s300_s3 = inlined_call_operand.hbm [shape: f32[16,128], index: 3, kind: output, shape index: {}]  }
   0x1   :  { %9 = vsyncpa [#allocation6], 0 }
   0x2   :  { %10 = vsyncpa [#allocation4], 0  ;;  %s249_s12 = smov [#allocation2]  }
   0x3   :  { %s16_s13 = sshll.u32 %s249_s12, 4  ;;  %s17_s13 = int_to_ptr.vmem [resolvable:$true] %s16_s13 }
   0x4   :  { %s191_s14 = scalar_lea.vmem %s17_s13, 256  ;;  %p196_p1 = scmp.lt.s32.totalorder %s17_s13, %s17_s13 }
   0x5   :  { %p192_p0 = scmp.ne.s32.totalorder %s17_s13, %s191_s14  ;;  %p197_p2 = scmp.lt.s32.totalorder %s191_s14, %s191_s14 }
   0x7   :  { %p198_p3 = por %p197_p2, %p196_p1 }
   0x9   :  { %p199_p4 = pnand %p198_p3, %p192_p0 }
   0xb   :  { %202 = shalt.err (!%p199_p4)
}
   0xc   :  { %s250_s15 = smov 128   ;;  %s251_s16 = smov 8  }
   0xd   :  { %22 = dma.hbm_to_vmem [thread:$0]  %s297_s0, 256, %s17_s13, [#allocation3], %s250_s15, %s250_s15, %s251_s16  }
   0xe   :  { %s252_s19 = smov [#allocation5]  }
   0xf   :  { %s28_s20 = sshll.u32 %s252_s19, 4  ;;  %s29_s20 = int_to_ptr.vmem [resolvable:$true] %s28_s20 }
  0x10   :  { %s211_s21 = scalar_lea.vmem %s29_s20, 512  ;;  %p216_p6 = scmp.lt.s32.totalorder %s29_s20, %s29_s20 }
  0x11   :  { %p212_p5 = scmp.ne.s32.totalorder %s29_s20, %s211_s21  ;;  %p217_p7 = scmp.lt.s32.totalorder %s211_s21, %s211_s21 }
  0x13   :  { %p218_p8 = por %p217_p7, %p216_p6 }
  0x15   :  { %p219_p9 = pnand %p218_p8, %p212_p5 }
  0x17   :  { %222 = shalt.err (!%p219_p9)
}
  0x18   :  { %34 = dma.hbm_to_vmem [thread:$0]  %s298_s1, 512, %s29_s20, [#allocation6], %s250_s15, %s250_s15, %s251_s16  }
  0x19   :  { %243 = dma.done.wait [#allocation3], 256  }
  0x1a   :  { %244 = vsyncadd [#allocation3], 4294967040 }
  0x1b   :  { %245 = dma.done.wait [#allocation6], 512  }
  0x1c   :  { %246 = vsyncadd [#allocation6], 4294966784  ;;  %vm56_vm0 = vcmask 261120   ;;  %v48_v0 = vld [vmem:[#allocation5 + $0x18] sm:$0xff]  ;;  %v47_v1 = vld [vmem:[#allocation5 + $0x10] sm:$0xff]  ;;  %s253_s24 = smov [#allocation7]  }
  0x1d   :  { %167 = vmatprep.subr.mxu0 %v48_v0  ;;  %v43_v2 = vld [vmem:[#allocation2] sm:$0xff]  ;;  %v46_v3 = vld [vmem:[#allocation5 + $0x8] sm:$0xff]  ;;  %v45_v4 = vld [vmem:[#allocation5] sm:$0xff]  ;;  %s145_s25 = sshll.u32 %s253_s24, 4  ;;  %s146_s25 = int_to_ptr.vmem [resolvable:$true] %s145_s25 }
  0x1e   :  { %168 = vmatpush3.msra.mxu0 %v48_v0  ;;  %175 = vmatprep.mubr.msk.f32.mxu0 %vm56_vm0, %v43_v2  ;;  %v44_v5 = vld [vmem:[#allocation2 + $0x8] sm:$0xff]  ;;  %v158_v6 = vld [vmem:[%s299_s2] ss:$0 sm:$0xff]  ;;  %s223_s26 = scalar_lea.vmem %s146_s25, 256  ;;  %p228_p11 = scmp.lt.s32.totalorder %s146_s25, %s146_s25 }
  0x1f   :  { %169 = vmatprep.subr.mxu0 %v47_v1  ;;  %p224_p10 = scmp.ne.s32.totalorder %s146_s25, %s223_s26  ;;  %p229_p12 = scmp.lt.s32.totalorder %s223_s26, %s223_s26 }
  0x20   :  { %170 = vmatpush3.msra.mxu0 %v47_v1 }
  0x21   :  { %171 = vmatprep.subr.mxu0 %v46_v3  ;;  %p230_p13 = por %p229_p12, %p228_p11 }
  0x22   :  { %172 = vmatpush3.msra.mxu0 %v46_v3 }
  0x23   :  { %173 = vmatprep.subr.mxu0 %v45_v4  ;;  %p231_p0 = pnand %p230_p13, %p224_p10 }
  0x24   :  { %174 = vmatpush3.msra.mxu0 %v45_v4 }
  0x25   :  { %176 = vmatmul.mubr.msk.f32.vlgmr.msra.gmra.mxu0 %vm56_vm0, %v44_v5 }
  0xe5   :  { %v177_v7 = vpop.f32.mrf.mxu0 }
  0xe6   :  { %v135_v8 = vadd.f32 %v177_v7, %v158_v6 }
  0xe7   :  { %v129_v9 = vpop.f32.mrf.mxu0 }
  0xe8   :  { %139 = vst [vmem:[#allocation7 + $0x8] sm:$0xff] %v135_v8  ;;  %v130_v10 = vadd.f32 %v158_v6, %v129_v9 }
  0xea   :  { %138 = vst [vmem:[#allocation7] sm:$0xff] %v130_v10 }
  0xeb   :  { %234 = shalt.err (!%p231_p0)
}
  0xec   :  { %151 = dma.vmem_to_hbm [thread:$0]  %s146_s25, 256, %s300_s3, [#allocation4], %s250_s15, %s250_s15, %s251_s16  }
  0xed   :  { %247 = dma.done.wait [#allocation4], 256  }
  0xee   :  { %248 = vsyncadd [#allocation4], 4294967040 }
  0xef   :  { %155 = vsyncpa [#allocation3], 1 }
  0xf0   :  { %156 = vsyncpa [#allocation6], 1 }
  0xf1   :  { %157 = vsyncpa [#allocation4], 1 }

</bundles_post_ra>
